<compile_context>
chip_gen: v7x
topology: tpu7x:2x2x1
jax: 0.10.0
libtpu: 0.0.40
codegen_flags: <defaults>
</compile_context>

<pallas_src>
import functools

import jax
import jax.numpy as jnp
from jax.experimental import pallas as pl
from jax.experimental.pallas import tpu as pltpu


def _round_up(x, m):
    return ((x + m - 1) // m) * m


def _vmem_capacity_bytes():
    """Physical VMEM per TensorCore; conservative 64 MiB (v7x) if unknown."""
    try:
        info = pltpu.get_tpu_info()
        cap = getattr(info, "vmem_capacity_bytes", None)
        if cap:
            return int(cap)
    except Exception:
        pass
    return 64 * 1024 * 1024


# ---------------------------------------------------------------------------
# Kernel 1: column softmax over the weight matrix (softmax over in_neurons).
# O(K*N) work -> hoisted out of the matmul so the matmul can K-tile and keep
# both batch/out grid axes parallel.
# ---------------------------------------------------------------------------
def _col_softmax_kernel(w_ref, o_ref, *, inv_temp):
    w = w_ref[...].astype(jnp.float32) * inv_temp
    w_max = jnp.max(w, axis=0, keepdims=True)
    e = jnp.exp(w - w_max)
    denom = jnp.sum(e, axis=0, keepdims=True)
    # Exact divide: this kernel is off the hot path; keeps the sharp
    # (temp=0.01) softmax as tight as possible.
    o_ref[...] = (e / denom).astype(o_ref.dtype)


def _column_softmax(weights, temp, n_pad, tn, operand_dtype, vmem_cap):
    k, n = weights.shape
    wp = weights if n_pad == n else jnp.pad(weights, ((0, 0), (0, n_pad - n)))

    def tile_bytes(t):  # double-buffered f32 in-tile + narrow out-tile
        return 2 * (k * t * wp.dtype.itemsize
                    + k * t * jnp.dtype(operand_dtype).itemsize)

    # Use the matmul's tn when it fits comfortably; otherwise 128 lanes
    # (always divides n_pad, which is a multiple of tn and tn % 128 == 0).
    tn_soft = tn if tile_bytes(tn) <= vmem_cap // 2 else 128
    vmem_limit = int(min(max(tile_bytes(tn_soft) + (2 << 20), 16 << 20),
                         vmem_cap - (2 << 20)))

    kernel = functools.partial(_col_softmax_kernel, inv_temp=1.0 / float(temp))
    return pl.pallas_call(
        kernel,
        out_shape=jax.ShapeDtypeStruct((k, n_pad), operand_dtype),
        grid_spec=pltpu.PrefetchScalarGridSpec(
            num_scalar_prefetch=0,
            grid=(n_pad // tn_soft,),
            in_specs=[pl.BlockSpec((k, tn_soft), lambda j: (0, j))],
            out_specs=pl.BlockSpec((k, tn_soft), lambda j: (0, j)),
        ),
        compiler_params=pltpu.CompilerParams(
            dimension_semantics=("parallel",),
            vmem_limit_bytes=vmem_limit,
        ),
    )(wp)


# ---------------------------------------------------------------------------
# Kernel 2: tiled matmul  out[i,j] = sum_k x[i,k] @ soft_w[k,j]
# f32 accumulator scratch, init at k==0, writeback at last k (P3 pattern).
# ---------------------------------------------------------------------------
def _matmul_kernel(x_ref, w_ref, o_ref, acc_ref):
    @pl.when(pl.program_id(2) == 0)
    def _():
        acc_ref[...] = jnp.zeros_like(acc_ref)

    acc_ref[...] += jnp.dot(x_ref[...], w_ref[...],
                            preferred_element_type=jnp.float32)

    @pl.when(pl.program_id(2) == pl.num_programs(2) - 1)
    def _():
        o_ref[...] = acc_ref[...].astype(o_ref.dtype)


def _select_xla(x, weights, temp, out_dtype):
    soft_w = jax.nn.softmax(weights.astype(jnp.float32) / float(temp), axis=0)
    return (x.astype(jnp.float32) @ soft_w).astype(out_dtype)


def select_forward(x, weights, temp=0.01, *, tm=None, tn=None, tk=None,
                   out_dtype=None, operand_dtype=jnp.bfloat16,
                   prefer_pallas=None):
    """Pallas equivalent of SELECT.forward: x @ softmax(weights / temp, axis=0).

    operand_dtype: dtype fed to the MXU (bf16 default; pass jnp.float32 for
    bit-tighter fidelity at ~2x HBM traffic).  Accumulation is always f32.
    """
    batch, in_neurons = x.shape
    in_w, out_neurons = weights.shape
    assert in_w == in_neurons
    if out_dtype is None:
        out_dtype = x.dtype

    # Tiny sub-tile problems: padding + per-grid-step overhead dominates;
    # let XLA fuse softmax + matmul instead.
    if prefer_pallas is None:
        prefer_pallas = (batch * out_neurons >= 128 * 128)
    if not prefer_pallas:
        return _select_xla(x, weights, temp, out_dtype)

    # ---- generation-aware tile caps / VMEM budget --------------------------
    vmem_cap = _vmem_capacity_bytes()
    big_vmem = vmem_cap >= 100 * 1024 * 1024      # v5e / v6e (128 MiB)
    tn_cap = 1024 if big_vmem else 512            # v7x (64 MiB): stay at 512
    tm_cap, tk_cap = 512, 512
    budget = int(vmem_cap * 0.8)                  # ~102 MiB v5e/v6e, ~51 MiB v7x

    if tn is None:
        tn = min(tn_cap, _round_up(out_neurons, 128))
    if tm is None:
        tm = min(tm_cap, _round_up(batch, 8))
    if tk is None:
        tk = min(tk_cap, _round_up(in_neurons, 128))
    assert tn % 128 == 0 and tk % 128 == 0 and tm % 8 == 0

    x_isz = jnp.dtype(operand_dtype).itemsize
    o_isz = jnp.dtype(out_dtype).itemsize

    def _need(tm_, tn_, tk_):
        # double-buffered x / w / out tiles + f32 accumulator scratch
        return (2 * (tm_ * tk_ * x_isz + tk_ * tn_ * x_isz + tm_ * tn_ * o_isz)
                + tm_ * tn_ * 4)

    # Shrink tiles (tm first, then tk, then tn) until they fit the budget.
    while _need(tm, tn, tk) > budget:
        if tm > 64:
            tm = max(64, _round_up(tm // 2, 8))
        elif tk > 128:
            tk = max(128, _round_up(tk // 2, 128))
        elif tn > 128:
            tn = max(128, _round_up(tn // 2, 128))
        else:
            break

    batch_p = _round_up(batch, tm)
    out_p = _round_up(out_neurons, tn)
    k_p = _round_up(in_neurons, tk)

    # ---- hoisted column softmax (bf16 soft-weights), then pad -------------
    # Softmax runs on the *unpadded* K so padded rows can't pollute the denom;
    # padded output columns get a uniform softmax and are sliced off below.
    soft_w = _column_softmax(weights, temp, out_p, tn, operand_dtype, vmem_cap)
    if k_p != in_neurons:
        soft_w = jnp.pad(soft_w, ((0, k_p - in_neurons), (0, 0)))  # zero rows

    xp = x.astype(operand_dtype)
    if batch_p != batch or k_p != in_neurons:
        xp = jnp.pad(xp, ((0, batch_p - batch), (0, k_p - in_neurons)))

    # ---- VMEM limit: never below the actual need, never above physical ----
    vmem_need = _need(tm, tn, tk)
    vmem_limit = min(max(int(1.5 * vmem_need), 32 << 20), budget)
    vmem_limit = max(vmem_limit, vmem_need + (2 << 20))
    vmem_limit = int(min(vmem_limit, vmem_cap - (2 << 20)))

    grid = (batch_p // tm, out_p // tn, k_p // tk)

    out_padded = pl.pallas_call(
        _matmul_kernel,
        out_shape=jax.ShapeDtypeStruct((batch_p, out_p), out_dtype),
        grid_spec=pltpu.PrefetchScalarGridSpec(
            num_scalar_prefetch=0,
            grid=grid,
            in_specs=[
                pl.BlockSpec((tm, tk), lambda i, j, k: (i, k)),
                pl.BlockSpec((tk, tn), lambda i, j, k: (k, j)),
            ],
            out_specs=pl.BlockSpec((tm, tn), lambda i, j, k: (i, j)),
            scratch_shapes=[pltpu.VMEM((tm, tn), jnp.float32)],
        ),
        compiler_params=pltpu.CompilerParams(
            # batch + out axes parallel (megacore on v7x's 2 TCs); the K
            # reduction axis is last and "arbitrary" (accumulator residency).
            dimension_semantics=("parallel", "parallel", "arbitrary"),
            vmem_limit_bytes=vmem_limit,
        ),
    )(xp, soft_w)

    return out_padded[:batch, :out_neurons]


def select_reference(x, weights, temp=0.01):
    """Pure-JAX reference (mirrors the PyTorch forward, all-f32)."""
    soft_w = jax.nn.softmax(weights.astype(jnp.float32) / temp, axis=0)
    return (x.astype(jnp.float32) @ soft_w).astype(x.dtype)


if __name__ == "__main__":
    key = jax.random.PRNGKey(0)
    k_x, k_w, k_x2, k_w2, k_x3, k_w3 = jax.random.split(key, 6)

    # --- shipped module-sized test: batch=8, in=32, out=16 (forced Pallas) --
    batch, in_neurons, out_neurons, temp = 8, 32, 16, 0.01
    weights = jax.random.uniform(
        k_w, (in_neurons, out_neurons), dtype=jnp.float32, minval=-1.0, maxval=1.0
    )
    x = jax.random.bernoulli(k_x, 0.5, (batch, in_neurons)).astype(jnp.float32)

    out = jax.block_until_ready(
        select_forward(x, weights, temp=temp, prefer_pallas=True)
    )
    ref = select_reference(x, weights, temp=temp)
    assert out.shape == (batch, out_neurons)
    # bf16 MXU operands -> relaxed tolerance vs the all-f32 reference.
    assert jnp.allclose(out, ref, atol=2e-2, rtol=2e-2), (
        f"max abs err {jnp.max(jnp.abs(out - ref))}"
    )

    # --- multi-tile test (padding on every axis + K-tiled accumulator) -----
    b2, k2, n2, temp2 = 600, 96, 300, 0.05
    w2 = jax.random.uniform(k_w2, (k2, n2), dtype=jnp.float32, minval=-1.0, maxval=1.0)
    x2 = jax.random.uniform(k_x2, (b2, k2), dtype=jnp.float32)

    out2 = jax.block_until_ready(
        select_forward(x2, w2, temp=temp2, tm=256, tn=128, tk=128)
    )
    ref2 = select_reference(x2, w2, temp=temp2)
    assert out2.shape == (b2, n2)
    assert jnp.allclose(out2, ref2, atol=3e-2, rtol=3e-2), (
        f"max abs err {jnp.max(jnp.abs(out2 - ref2))}"
    )

    # --- tiny-shape fallback path (auto XLA softmax+matmul) ----------------
    b3, k3, n3 = 4, 16, 8
    w3 = jax.random.uniform(k_w3, (k3, n3), dtype=jnp.float32, minval=-1.0, maxval=1.0)
    x3 = jax.random.uniform(k_x3, (b3, k3), dtype=jnp.float32)
    out3 = jax.block_until_ready(select_forward(x3, w3, temp=0.01))
    ref3 = select_reference(x3, w3, temp=0.01)
    assert jnp.allclose(out3, ref3, atol=1e-5, rtol=1e-5)

    print("KERNEL_OK")
</pallas_src>

<mosaic_0001>
module attributes {stable_mosaic.version = 11 : i64} {
  func.func @_col_softmax_kernel(%arg0: i32, %arg1: memref<32x128xf32, #tpu.memory_space<vmem>>, %arg2: memref<32x128xbf16, #tpu.memory_space<vmem>>) attributes {dimension_semantics = [#tpu.dimension_semantics<parallel>], iteration_bounds = array<i64: 1>, scalar_prefetch = 0 : i64, scratch_operands = 0 : i64, tpu.core_type = #tpu.core_type<tc>, window_params = [{transform_indices = @transform_0, window_bounds = array<i64: 32, 128>}, {transform_indices = @transform_1, window_bounds = array<i64: 32, 128>}]} {
    %c0 = arith.constant 0 : index
    %c0_0 = arith.constant 0 : index
    %0 = vector.load %arg1[%c0, %c0_0] : memref<32x128xf32, #tpu.memory_space<vmem>>, vector<32x128xf32>
    %cst = arith.constant 1.000000e+02 : f32
    %1 = vector.broadcast %cst : f32 to vector<32x128xf32>
    %2 = arith.mulf %0, %1 : vector<32x128xf32>
    %cst_1 = arith.constant dense<0xFF800000> : vector<128xf32>
    %3 = vector.multi_reduction <maximumf>, %2, %cst_1 [0] : vector<32x128xf32> to vector<128xf32>
    %4 = vector.shape_cast %3 : vector<128xf32> to vector<1x128xf32>
    %5 = vector.broadcast %4 : vector<1x128xf32> to vector<32x128xf32>
    %6 = arith.subf %2, %5 : vector<32x128xf32>
    %7 = math.exp %6 : vector<32x128xf32>
    %cst_2 = arith.constant dense<0.000000e+00> : vector<128xf32>
    %8 = vector.multi_reduction <add>, %7, %cst_2 [0] : vector<32x128xf32> to vector<128xf32>
    %9 = vector.shape_cast %8 : vector<128xf32> to vector<1x128xf32>
    %10 = vector.broadcast %9 : vector<1x128xf32> to vector<32x128xf32>
    %11 = arith.divf %7, %10 : vector<32x128xf32>
    %12 = arith.truncf %11 : vector<32x128xf32> to vector<32x128xbf16>
    %c0_3 = arith.constant 0 : index
    %c0_4 = arith.constant 0 : index
    %13 = vector.load %arg2[%c0_3, %c0_4] : memref<32x128xbf16, #tpu.memory_space<vmem>>, vector<32x128xbf16>
    tpu.vector_store %arg2[%c0_3, %c0_4], %12 {strides = array<i32>} : memref<32x128xbf16, #tpu.memory_space<vmem>>, vector<32x128xbf16>,
    return
  }
  func.func @transform_0(%arg0: i32) -> (i32, i32) {
    %c0_i32 = arith.constant 0 : i32
    %c0_i32_0 = arith.constant 0 : i32
    return %c0_i32, %arg0 : i32, i32
  }
  func.func @transform_1(%arg0: i32) -> (i32, i32) {
    %c0_i32 = arith.constant 0 : i32
    %c0_i32_0 = arith.constant 0 : i32
    return %c0_i32, %arg0 : i32, i32
  }
}

</mosaic_0001>

<bundles_post_ra>
// kernel: tpu_custom_call.1
= control target key start
LH: loop header
LB: loop body
LE: loop exit
PB: predicated region body
PF: predicated region fallthrough
CT: control target
= control target key end

     0   :  { %6 = vsyncpa [#allocation3], 0  ;;  %s226_s0 = inlined_call_operand.hbm [shape: f32[32,128], index: 0, kind: input, shape index: {}]   ;;  %s227_s1 = inlined_call_operand.hbm [shape: bf16[32,128], index: 1, kind: output, shape index: {}]  }
   0x1   :  { %7 = vsyncpa [#allocation4], 0  ;;  %s186_s6 = smov [#allocation2]   ;;  %s138_s10 = scalar_lea.hbm %s226_s0, 512 }
   0x2   :  { %s13_s7 = sshll.u32 %s186_s6, 4  ;;  %p139_p0 = scmp.ne.s32.totalorder %s226_s0, %s138_s10  ;;  %s14_s7 = int_to_ptr.vmem [resolvable:$true] %s13_s7 }
   0x3   :  { %p142_p1 = scmp.lt.u32.totalorder %s138_s10, %s226_s0 }
   0x5   :  { %p144_p2 = pnand %p142_p1, %p139_p0 }
   0x7   :  { %147 = shalt.err (!%p144_p2)
}
   0x8   :  { %s148_s15 = scalar_lea.vmem %s14_s7, 512  ;;  %p153_p4 = scmp.lt.s32.totalorder %s14_s7, %s14_s7 }
   0x9   :  { %p149_p3 = scmp.ne.s32.totalorder %s14_s7, %s148_s15  ;;  %p154_p5 = scmp.lt.s32.totalorder %s148_s15, %s148_s15 }
   0xb   :  { %p155_p6 = por %p154_p5, %p153_p4 }
   0xd   :  { %p156_p7 = pnand %p155_p6, %p149_p3 }
   0xf   :  { %159 = shalt.err (!%p156_p7)
}
  0x10   :  { %s187_s16 = smov 128   ;;  %s188_s17 = smov 8  }
  0x11   :  { %19 = dma.hbm_to_vmem [thread:$0]  %s226_s0, 512, %s14_s7, [#allocation3], %s187_s16, %s187_s16, %s188_s17  }
  0x12   :  { %182 = dma.done.wait [#allocation3], 512  }
  0x13   :  { %183 = vsyncadd [#allocation3], 4294966784  ;;  %v23_v0 = vld [vmem:[#allocation2] sm:$0xff]  ;;  %v24_v1 = vld [vmem:[#allocation2 + $0x8] sm:$0xff]  ;;  %s189_s0 = smov [#allocation5]  }
  0x14   :  { %v25_v2 = vld [vmem:[#allocation2 + $0x10] sm:$0xff]  ;;  %v26_v3 = vld [vmem:[#allocation2 + $0x18] sm:$0xff]  ;;  %v27_v4 = vmul.f32 100.0, %v23_v0  ;;  %v28_v5 = vmul.f32 100.0, %v24_v1  ;;  %s91_s20 = sshll.u32 %s189_s0, 4  ;;  %s92_s20 = int_to_ptr.vmem [resolvable:$true] %s91_s20 }
  0x15   :  { %v29_v6 = vmul.f32 100.0, %v25_v2  ;;  %v30_v7 = vmul.f32 100.0, %v26_v3  ;;  %s160_s21 = scalar_lea.vmem %s92_s20, 256  ;;  %p165_p9 = scmp.lt.s32.totalorder %s92_s20, %s92_s20 }
  0x16   :  { %v31_v8 = vmax.f32 %v27_v4, %v28_v5  ;;  %p161_p8 = scmp.ne.s32.totalorder %s92_s20, %s160_s21  ;;  %p166_p10 = scmp.lt.s32.totalorder %s160_s21, %s160_s21 }
  0x17   :  { %v32_v9 = vmax.f32 %v29_v6, %v30_v7 }
  0x18   :  { %p167_p11 = por %p166_p10, %p165_p9 }
  0x19   :  { %v33_v10 = vmax.f32 %v31_v8, %v32_v9 }
  0x1a   :  { %p168_p12 = pnand %p167_p11, %p161_p8 }
  0x1b   :  { %v34_v11 = vrot.slane %v33_v10, 4 }
  0x1d   :  { %v35_v12 = vmax.f32 %v33_v10, %v34_v11 }
  0x1f   :  { %v36_v13 = vrot.slane %v35_v12, 2 }
  0x21   :  { %v37_v14 = vmax.f32 %v35_v12, %v36_v13 }
  0x23   :  { %v38_v15 = vrot.slane %v37_v14, 1 }
  0x25   :  { %v39_v16 = vmax.f32 %v37_v14, %v38_v15 }
  0x27   :  { %v40_v17 = vsub.f32 %v27_v4, %v39_v16  ;;  %v41_v18 = vsub.f32 %v28_v5, %v39_v16  ;;  %v42_v19 = vsub.f32 %v29_v6, %v39_v16  ;;  %v43_v20 = vsub.f32 %v30_v7, %v39_v16 }
  0x29   :  { %v44_v21 = vmul.f32 1.442695, %v40_v17  ;;  %v46_v22 = vmul.f32 1.442695, %v41_v18  ;;  %v48_v23 = vmul.f32 1.442695, %v42_v19 }
  0x2a   :  { %v50_v24 = vmul.f32 1.442695, %v43_v20 }
  0x2b   :  { %128 = vpow2.f32 %v44_v21 }
  0x2c   :  { %130 = vpow2.f32 %v46_v22 }
  0x2d   :  { %132 = vpow2.f32 %v48_v23 }
  0x2e   :  { %134 = vpow2.f32 %v50_v24 }
  0x35   :  { %v129_v25 = vpop.eup %128 }
  0x36   :  { %v131_v26 = vpop.eup %130 }
  0x37   :  { %v133_v27 = vpop.eup %132  ;;  %v52_v28 = vadd.f32 %v131_v26, %v129_v25 }
  0x38   :  { %v135_v29 = vpop.eup %134 }
  0x39   :  { %v53_v30 = vadd.f32 %v133_v27, %v52_v28 }
  0x3b   :  { %v54_v31 = vadd.f32 %v135_v29, %v53_v30 }
  0x3d   :  { %v55_v32 = vrot.slane %v54_v31, 4 }
  0x3f   :  { %v56_v33 = vadd.f32 %v55_v32, %v54_v31 }
  0x41   :  { %v57_v34 = vrot.slane %v56_v33, 2 }
  0x43   :  { %v58_v35 = vadd.f32 %v57_v34, %v56_v33 }
  0x45   :  { %v59_v36 = vrot.slane %v58_v35, 1 }
  0x47   :  { %v60_v37 = vadd.f32 %v59_v36, %v58_v35 }
  0x49   :  { %136 = vrcp.f32 %v60_v37 }
  0x53   :  { %v137_v38 = vpop.eup %136 }
  0x54   :  { %v62_v39 = vmul.f32 %v137_v38, %v129_v25  ;;  %v63_v40 = vmul.f32 %v137_v38, %v131_v26  ;;  %v64_v41 = vmul.f32 %v137_v38, %v133_v27  ;;  %v65_v42 = vmul.f32 %v137_v38, %v135_v29 }
  0x56   :  { %v114_v43 = vpack.c.bf16 %v63_v40, %v62_v39  ;;  %v119_v44 = vpack.c.bf16 %v65_v42, %v64_v41 }
  0x58   :  { %115 = vst [vmem:[#allocation5] sm:$0xff] %v114_v43   ;;  %121 = vst [vmem:[#allocation5 + $0x8] sm:$0xff] %v119_v44  }
  0x59   :  { %171 = shalt.err (!%p168_p12)
}
  0x5a   :  { %s172_s24 = scalar_lea.hbm %s227_s1, 256 }
  0x5b   :  { %p173_p13 = scmp.ne.s32.totalorder %s227_s1, %s172_s24  ;;  %p176_p0 = scmp.lt.u32.totalorder %s172_s24, %s227_s1 }
  0x5d   :  { %p178_p1 = pnand %p176_p0, %p173_p13 }
  0x5f   :  { %181 = shalt.err (!%p178_p1)
}
  0x60   :  { %s190_s29 = smov 64   ;;  %s191_s30 = smov 4  }
  0x61   :  { %97 = dma.vmem_to_hbm [thread:$0]  %s92_s20, 256, %s227_s1, [#allocation4], %s190_s29, %s190_s29, %s191_s30  }
  0x62   :  { %184 = dma.done.wait [#allocation4], 256  }
  0x63   :  { %185 = vsyncadd [#allocation4], 4294967040 }
  0x64   :  { %101 = vsyncpa [#allocation3], 1 }
  0x65   :  { %102 = vsyncpa [#allocation4], 1 }

</bundles_post_ra>
